<compile_context>
chip_gen: v6e
topology: v6e:2x2x1
jax: 0.10.0
libtpu: 0.0.40
codegen_flags: <defaults>
</compile_context>

<pallas_src>
import jax
import jax.numpy as jnp
from jax.experimental import pallas as pl
from jax.experimental.pallas import tpu as pltpu


# ----------------------------------------------------------------------------
# Pallas kernel: fully-folded CrossModalAttentionModule forward for TB batch elems.
# ----------------------------------------------------------------------------
def _cross_modal_attention_kernel(
    feat_ref,     # [TB, N, C]   bf16 feature block (already [N, C] per elem)
    wqk_ref,      # [C, Sp]      bf16: Wk @ query^T        (key proj + query folded)
    wv3_ref,      # [C, Sp]      bf16: Wv @ W3^T           (value+Wo+Wh+V_final+ratio)
    w2t_ref,      # [C, Sp]      f32 : (V_final @ Wh^T)^T  (pooled residual branch)
    bv3_ref,      # [1, Sp]      f32 : W3 @ bv             (value bias, inside attn sum)
    bout_ref,     # [1, Sp]      f32 : V_final@bh + ratio*(w2@bo)
    out_ref,      # [TB, Sp]     f32
):
    TB, N, C = feat_ref.shape
    S = wqk_ref.shape[1]

    feat = feat_ref[...]                                   # [TB, N, C]  bf16
    feat2d = feat.reshape(TB * N, C)                       # layout no-op (N % 8 == 0)

    # Attention logits: scores[t,n,s] = sum_c feat[t,n,c] * (Wk @ q^T)[c,s].
    # bk is dropped exactly (constant along the softmax axis, cancelled by the
    # max-subtracted softmax).  bf16 operands, f32 accumulation.
    scores = jnp.dot(feat2d, wqk_ref[...],
                     preferred_element_type=jnp.float32).reshape(TB, N, S)

    # softmax over N (axis=1).
    m = jnp.max(scores, axis=1, keepdims=True)             # [TB, 1, S]
    e = jnp.exp(scores - m)
    denom = jnp.sum(e, axis=1, keepdims=True)
    attn = e * pl.reciprocal(denom, approx=True)           # EUP vrcp slot (free)

    # Folded value path: vW3[t,n,s] = value[t,n,:] . W3[s,:]  (+ bv folded in too).
    # Keeping + bv3 inside the attention-weighted sum keeps it exact even though
    # the approx reciprocal means attention rows do not sum to exactly 1.
    vw3 = jnp.dot(feat2d, wv3_ref[...],
                  preferred_element_type=jnp.float32).reshape(TB, N, S)
    vw3 = vw3 + bv3_ref[...]
    att_term = jnp.sum(attn * vw3, axis=1, keepdims=True).reshape(TB, S)

    # Pooled residual branch: (mean_N feat) @ w2^T   (tiny f32 matmul).
    feat_pool = jnp.mean(feat.astype(jnp.float32), axis=1,
                         keepdims=True).reshape(TB, C)     # [TB, C]
    pool_term = jnp.dot(feat_pool, w2t_ref[...],
                        preferred_element_type=jnp.float32)  # [TB, S]

    out_ref[...] = (pool_term + att_term + bout_ref[...]).astype(out_ref.dtype)


# ----------------------------------------------------------------------------
# Generation-aware batch blocking.
# ----------------------------------------------------------------------------
def _num_tensorcores() -> int:
    # TODO(synk): no portable core-count query via pltpu; sniff the device kind
    # (v7x exposes 2 TensorCores per chip, v5e/v6e have 1).
    try:
        kind = jax.devices()[0].device_kind.lower()
    except Exception:
        return 1
    return 2 if "v7" in kind else 1


def _pick_blocking(B, N, num_tc, max_rows=2048):
    """Returns (tb, steps). Single-TC: one big step (whole batch resident).
    Multi-TC (v7x): step count a multiple of num_tc so both cores get equal work."""
    max_tb = max(1, max_rows // max(N, 1))
    if num_tc <= 1:
        tb = min(B, max_tb)
        steps = pl.cdiv(B, tb)
    else:
        steps = num_tc
        tb = pl.cdiv(B, steps)
        while tb > max_tb:
            steps += num_tc
            tb = pl.cdiv(B, steps)
    return tb, steps


# ----------------------------------------------------------------------------
# Wrapper: batch-invariant algebraic folding in XLA, grid over batch blocks.
# ----------------------------------------------------------------------------
def cross_modal_attention_pallas(feat, att_emb, params, ratio=1.0):
    """feat: [B, C, N] (module layout). Returns v2s: [B, S]."""
    B, C, N = feat.shape
    S, _ = att_emb.shape
    hp = jax.lax.Precision.HIGHEST

    # ---- batch-invariant folding (exact in real arithmetic) ----
    query = jnp.dot(att_emb, params["wq"], precision=hp) + params["bq"][0]   # [S, M]
    w2 = jnp.dot(params["v_final"], params["wh"].T, precision=hp)            # [S, C]
    b2 = jnp.dot(params["v_final"], params["bh"][0], precision=hp)           # [S]
    w3 = ratio * jnp.dot(w2, params["wo"].T, precision=hp)                   # [S, M]
    b3 = ratio * jnp.dot(w2, params["bo"][0], precision=hp)                  # [S]
    wqk = jnp.dot(params["wk"], query.T, precision=hp)                       # [C, S]
    wv3 = jnp.dot(params["wv"], w3.T, precision=hp)                          # [C, S]
    bv3 = jnp.dot(w3, params["bv"][0], precision=hp)                         # [S]
    w2t = w2.T                                                               # [C, S]
    bout = b2 + b3                                                           # [S]

    # ---- lane-dense padding of the attribute axis (zero cols, exact) ----
    s_pad = max(128, ((S + 127) // 128) * 128)
    pad_s = lambda a: jnp.pad(a, [(0, 0)] * (a.ndim - 1) + [(0, s_pad - S)])
    wqk_p, wv3_p, w2t_p = pad_s(wqk), pad_s(wv3), pad_s(w2t)
    bv3_p = pad_s(bv3[None, :])
    bout_p = pad_s(bout[None, :])

    # ---- feat to [B, N, C]; generation-aware blocking; batch padding ----
    feat_nc = jnp.transpose(feat, (0, 2, 1))                                 # [B, N, C]
    tb, steps = _pick_blocking(B, N, _num_tensorcores())
    b_pad = tb * steps
    if b_pad != B:
        feat_nc = jnp.pad(feat_nc, ((0, b_pad - B), (0, 0), (0, 0)))

    # ---- bf16 MXU operands (accumulation stays f32 inside the kernel) ----
    feat_bf = feat_nc.astype(jnp.bfloat16)
    wqk_bf = wqk_p.astype(jnp.bfloat16)
    wv3_bf = wv3_p.astype(jnp.bfloat16)

    full2 = lambda b: (0, 0)  # noqa: E731

    out = pl.pallas_call(
        _cross_modal_attention_kernel,
        out_shape=jax.ShapeDtypeStruct((b_pad, s_pad), jnp.float32),
        grid_spec=pltpu.PrefetchScalarGridSpec(
            num_scalar_prefetch=0,
            grid=(steps,),
            in_specs=[
                pl.BlockSpec((tb, N, C), lambda b: (b, 0, 0)),   # feat block
                pl.BlockSpec((C, s_pad), full2),                 # Wqk (bf16)
                pl.BlockSpec((C, s_pad), full2),                 # Wv3 (bf16)
                pl.BlockSpec((C, s_pad), full2),                 # w2^T (f32)
                pl.BlockSpec((1, s_pad), full2),                 # bv3
                pl.BlockSpec((1, s_pad), full2),                 # bout
            ],
            out_specs=pl.BlockSpec((tb, s_pad), lambda b: (b, 0)),
        ),
        compiler_params=pltpu.CompilerParams(
            dimension_semantics=("parallel",),
        ),
    )(feat_bf, wqk_bf, wv3_bf, w2t_p, bv3_p, bout_p)

    return out[:B, :S]


# ----------------------------------------------------------------------------
# Pure-JAX reference (mirrors the PyTorch forward exactly, un-folded, f32).
# ----------------------------------------------------------------------------
def cross_modal_attention_ref(feat, att_emb, params, ratio=1.0):
    query = att_emb @ params["wq"] + params["bq"][0]            # [S, M]
    feat_t = jnp.transpose(feat, (0, 2, 1))                      # [B, N, C]
    key = feat_t @ params["wk"] + params["bk"][0]                # [B, N, M]
    value = feat_t @ params["wv"] + params["bv"][0]              # [B, N, M]
    scores = jnp.einsum("sm,bnm->bsn", query, key)               # [B, S, N]
    attn = jax.nn.softmax(scores, axis=2)
    attended = jnp.einsum("bsn,bnm->bsm", attn, value)           # [B, S, M]
    att_o = attended @ params["wo"] + params["bo"][0]            # [B, S, C]
    feat_pool = jnp.mean(feat, axis=2)                           # [B, C]
    final = feat_pool[:, None, :] + ratio * att_o                # [B, S, C]
    hid = final @ params["wh"] + params["bh"][0]                 # [B, S, H]
    return jnp.einsum("bsh,sh->bs", hid, params["v_final"])      # [B, S]


# ----------------------------------------------------------------------------
# Backbone stub (glue): 1x1 conv + spatial average-pool to (w, h).
# ----------------------------------------------------------------------------
def backbone_stub(x, w_conv, feat_w, feat_h):
    # x: [B, C_in, H_img, W_img] (NCHW) -> feat: [B, C, feat_w, feat_h]
    y = jnp.einsum("bchw,cd->bdhw", x, w_conv)
    B, C, Hi, Wi = y.shape
    y = y.reshape(B, C, feat_w, Hi // feat_w, feat_h, Wi // feat_h)
    return y.mean(axis=(3, 5))


# ----------------------------------------------------------------------------
# Main
# ----------------------------------------------------------------------------
if __name__ == "__main__":
    # Small, module-consistent shapes (attritube_num == 85 -> med_dim == 300).
    B = 2          # batch
    C_IN = 3       # image channels
    IMG = 32       # image spatial size
    C = 64         # feat_channel
    FW = FH = 4    # feat_w, feat_h
    N = FW * FH    # feat_n
    S = 85         # attritube_num
    L = 300        # w2v_length
    M = 300        # med_dim (attritube_num == 85 branch)
    HID = 32       # hid_dim (> 0 -> hidden branch)
    RATIO = 1.0

    key = jax.random.PRNGKey(0)
    keys = jax.random.split(key, 16)

    x = jax.random.normal(keys[0], (B, C_IN, IMG, IMG), dtype=jnp.float32)
    w2v_att = jax.random.normal(keys[1], (S, L), dtype=jnp.float32)
    w_backbone = jax.random.normal(keys[2], (C_IN, C), dtype=jnp.float32) * 0.1

    def lin_init(kw, kb, fan_in, fan_out):
        bound = 1.0 / jnp.sqrt(fan_in)
        w = jax.random.uniform(kw, (fan_in, fan_out), jnp.float32, -bound, bound)
        b = jax.random.uniform(kb, (1, fan_out), jnp.float32, -bound, bound)
        return w, b

    wq, bq = lin_init(keys[3], keys[4], L, M)
    wk, bk = lin_init(keys[5], keys[6], C, M)
    wv, bv = lin_init(keys[7], keys[8], C, M)
    wo, bo = lin_init(keys[9], keys[10], M, C)
    wh, bh = lin_init(keys[11], keys[12], C, HID)
    v_final = jax.random.normal(keys[13], (S, HID), dtype=jnp.float32)

    params = dict(
        wq=wq, bq=bq, wk=wk, bk=bk, wv=wv, bv=bv,
        wo=wo, bo=bo, wh=wh, bh=bh, v_final=v_final,
    )

    # conv_features: backbone -> [B, C, FW, FH] -> reshape to [B, C, N]
    feat = backbone_stub(x, w_backbone, FW, FH).reshape(B, C, N)

    v2s = cross_modal_attention_pallas(feat, w2v_att, params, ratio=RATIO)
    v2s = jax.block_until_ready(v2s)

    v2s_ref = cross_modal_attention_ref(feat, w2v_att, params, ratio=RATIO)
    assert v2s.shape == (B, S)
    # Tolerance accounts for: bf16 MXU operands (f32 accumulation), the EUP
    # approximate reciprocal in the softmax denominator, and the changed float
    # accumulation order from the exact algebraic weight folds.
    assert jnp.allclose(v2s, v2s_ref, rtol=1e-2, atol=5e-3), (
        float(jnp.max(jnp.abs(v2s - v2s_ref)))
    )

    print("KERNEL_OK")
</pallas_src>

<mosaic_0001>
module attributes {stable_mosaic.version = 11 : i64} {
  func.func @_cross_modal_attention_kernel(%arg0: i32, %arg1: memref<2x16x64xbf16, #tpu.memory_space<vmem>>, %arg2: memref<64x128xbf16, #tpu.memory_space<vmem>>, %arg3: memref<64x128xbf16, #tpu.memory_space<vmem>>, %arg4: memref<64x128xf32, #tpu.memory_space<vmem>>, %arg5: memref<1x128xf32, #tpu.memory_space<vmem>>, %arg6: memref<1x128xf32, #tpu.memory_space<vmem>>, %arg7: memref<2x128xf32, #tpu.memory_space<vmem>>) attributes {dimension_semantics = [#tpu.dimension_semantics<parallel>], iteration_bounds = array<i64: 1>, scalar_prefetch = 0 : i64, scratch_operands = 0 : i64, tpu.core_type = #tpu.core_type<tc>, window_params = [{transform_indices = @transform_0, window_bounds = array<i64: 2, 16, 64>}, {pipeline_mode = #tpu.pipeline_mode<synchronous>, transform_indices = @transform_1, window_bounds = array<i64: 64, 128>}, {pipeline_mode = #tpu.pipeline_mode<synchronous>, transform_indices = @transform_2, window_bounds = array<i64: 64, 128>}, {pipeline_mode = #tpu.pipeline_mode<synchronous>, transform_indices = @transform_3, window_bounds = array<i64: 64, 128>}, {pipeline_mode = #tpu.pipeline_mode<synchronous>, transform_indices = @transform_4, window_bounds = array<i64: 1, 128>}, {pipeline_mode = #tpu.pipeline_mode<synchronous>, transform_indices = @transform_5, window_bounds = array<i64: 1, 128>}, {transform_indices = @transform_6, window_bounds = array<i64: 2, 128>}]} {
    %c0 = arith.constant 0 : index
    %c0_0 = arith.constant 0 : index
    %c0_1 = arith.constant 0 : index
    %0 = vector.load %arg1[%c0, %c0_0, %c0_1] : memref<2x16x64xbf16, #tpu.memory_space<vmem>>, vector<2x16x64xbf16>
    %1 = vector.shape_cast %0 : vector<2x16x64xbf16> to vector<32x64xbf16>
    %c0_2 = arith.constant 0 : index
    %c0_3 = arith.constant 0 : index
    %2 = vector.load %arg2[%c0_2, %c0_3] : memref<64x128xbf16, #tpu.memory_space<vmem>>, vector<64x128xbf16>
    %cst = arith.constant dense<0.000000e+00> : vector<32x128xf32>
    %3 = tpu.matmul %1, %2, %cst {dimension_numbers = #tpu.dot_dimension_numbers<[1], [0], [0], [1], [0, 0, 1, 1], [], []>} : vector<32x64xbf16>, vector<64x128xbf16>, vector<32x128xf32> -> vector<32x128xf32>
    %4 = vector.shape_cast %3 : vector<32x128xf32> to vector<2x16x128xf32>
    %cst_4 = arith.constant dense<0xFF800000> : vector<2x128xf32>
    %5 = vector.multi_reduction <maximumf>, %4, %cst_4 [1] : vector<2x16x128xf32> to vector<2x128xf32>
    %6 = vector.shape_cast %5 : vector<2x128xf32> to vector<2x1x128xf32>
    %7 = vector.broadcast %6 : vector<2x1x128xf32> to vector<2x16x128xf32>
    %8 = arith.subf %4, %7 : vector<2x16x128xf32>
    %9 = math.exp %8 : vector<2x16x128xf32>
    %cst_5 = arith.constant dense<0.000000e+00> : vector<2x128xf32>
    %10 = vector.multi_reduction <add>, %9, %cst_5 [1] : vector<2x16x128xf32> to vector<2x128xf32>
    %11 = vector.shape_cast %10 : vector<2x128xf32> to vector<2x1x128xf32>
    %12 = tpu.reciprocal %11 {approx = true} : vector<2x1x128xf32> -> vector<2x1x128xf32>
    %13 = vector.broadcast %12 : vector<2x1x128xf32> to vector<2x16x128xf32>
    %14 = arith.mulf %9, %13 : vector<2x16x128xf32>
    %c0_6 = arith.constant 0 : index
    %c0_7 = arith.constant 0 : index
    %15 = vector.load %arg3[%c0_6, %c0_7] : memref<64x128xbf16, #tpu.memory_space<vmem>>, vector<64x128xbf16>
    %cst_8 = arith.constant dense<0.000000e+00> : vector<32x128xf32>
    %16 = tpu.matmul %1, %15, %cst_8 {dimension_numbers = #tpu.dot_dimension_numbers<[1], [0], [0], [1], [0, 0, 1, 1], [], []>} : vector<32x64xbf16>, vector<64x128xbf16>, vector<32x128xf32> -> vector<32x128xf32>
    %17 = vector.shape_cast %16 : vector<32x128xf32> to vector<2x16x128xf32>
    %c0_9 = arith.constant 0 : index
    %c0_10 = arith.constant 0 : index
    %18 = vector.load %arg5[%c0_9, %c0_10] : memref<1x128xf32, #tpu.memory_space<vmem>>, vector<1x128xf32>
    %19 = vector.shape_cast %18 : vector<1x128xf32> to vector<1x1x128xf32>
    %20 = vector.broadcast %19 : vector<1x1x128xf32> to vector<2x16x128xf32>
    %21 = arith.addf %17, %20 : vector<2x16x128xf32>
    %22 = arith.mulf %14, %21 : vector<2x16x128xf32>
    %cst_11 = arith.constant dense<0.000000e+00> : vector<2x128xf32>
    %23 = vector.multi_reduction <add>, %22, %cst_11 [1] : vector<2x16x128xf32> to vector<2x128xf32>
    %24 = vector.shape_cast %23 : vector<2x128xf32> to vector<2x1x128xf32>
    %25 = vector.shape_cast %24 : vector<2x1x128xf32> to vector<2x128xf32>
    %26 = arith.extf %0 : vector<2x16x64xbf16> to vector<2x16x64xf32>
    %cst_12 = arith.constant dense<0.000000e+00> : vector<2x64xf32>
    %27 = vector.multi_reduction <add>, %26, %cst_12 [1] : vector<2x16x64xf32> to vector<2x64xf32>
    %28 = vector.shape_cast %27 : vector<2x64xf32> to vector<2x1x64xf32>
    %cst_13 = arith.constant 1.600000e+01 : f32
    %29 = vector.broadcast %cst_13 : f32 to vector<2x1x64xf32>
    %30 = arith.divf %28, %29 : vector<2x1x64xf32>
    %31 = vector.shape_cast %30 : vector<2x1x64xf32> to vector<2x64xf32>
    %c0_14 = arith.constant 0 : index
    %c0_15 = arith.constant 0 : index
    %32 = vector.load %arg4[%c0_14, %c0_15] : memref<64x128xf32, #tpu.memory_space<vmem>>, vector<64x128xf32>
    %cst_16 = arith.constant dense<0.000000e+00> : vector<2x128xf32>
    %33 = tpu.matmul %31, %32, %cst_16 {dimension_numbers = #tpu.dot_dimension_numbers<[1], [0], [0], [1], [0, 0, 1, 1], [], []>} : vector<2x64xf32>, vector<64x128xf32>, vector<2x128xf32> -> vector<2x128xf32>
    %34 = arith.addf %33, %25 : vector<2x128xf32>
    %c0_17 = arith.constant 0 : index
    %c0_18 = arith.constant 0 : index
    %35 = vector.load %arg6[%c0_17, %c0_18] : memref<1x128xf32, #tpu.memory_space<vmem>>, vector<1x128xf32>
    %36 = vector.broadcast %35 : vector<1x128xf32> to vector<2x128xf32>
    %37 = arith.addf %34, %36 : vector<2x128xf32>
    %c0_19 = arith.constant 0 : index
    %c0_20 = arith.constant 0 : index
    %38 = vector.load %arg7[%c0_19, %c0_20] : memref<2x128xf32, #tpu.memory_space<vmem>>, vector<2x128xf32>
    tpu.vector_store %arg7[%c0_19, %c0_20], %37 {strides = array<i32>} : memref<2x128xf32, #tpu.memory_space<vmem>>, vector<2x128xf32>,
    return
  }
  func.func @transform_0(%arg0: i32) -> (i32, i32, i32) {
    %c0_i32 = arith.constant 0 : i32
    %c0_i32_0 = arith.constant 0 : i32
    %c0_i32_1 = arith.constant 0 : i32
    return %arg0, %c0_i32, %c0_i32_0 : i32, i32, i32
  }
  func.func @transform_1(%arg0: i32) -> (i32, i32) {
    %c0_i32 = arith.constant 0 : i32
    %c0_i32_0 = arith.constant 0 : i32
    %c0_i32_1 = arith.constant 0 : i32
    return %c0_i32, %c0_i32_0 : i32, i32
  }
  func.func @transform_2(%arg0: i32) -> (i32, i32) {
    %c0_i32 = arith.constant 0 : i32
    %c0_i32_0 = arith.constant 0 : i32
    %c0_i32_1 = arith.constant 0 : i32
    return %c0_i32, %c0_i32_0 : i32, i32
  }
  func.func @transform_3(%arg0: i32) -> (i32, i32) {
    %c0_i32 = arith.constant 0 : i32
    %c0_i32_0 = arith.constant 0 : i32
    %c0_i32_1 = arith.constant 0 : i32
    return %c0_i32, %c0_i32_0 : i32, i32
  }
  func.func @transform_4(%arg0: i32) -> (i32, i32) {
    %c0_i32 = arith.constant 0 : i32
    %c0_i32_0 = arith.constant 0 : i32
    %c0_i32_1 = arith.constant 0 : i32
    return %c0_i32, %c0_i32_0 : i32, i32
  }
  func.func @transform_5(%arg0: i32) -> (i32, i32) {
    %c0_i32 = arith.constant 0 : i32
    %c0_i32_0 = arith.constant 0 : i32
    %c0_i32_1 = arith.constant 0 : i32
    return %c0_i32, %c0_i32_0 : i32, i32
  }
  func.func @transform_6(%arg0: i32) -> (i32, i32) {
    %c0_i32 = arith.constant 0 : i32
    %c0_i32_0 = arith.constant 0 : i32
    return %arg0, %c0_i32 : i32, i32
  }
}

</mosaic_0001>

<bundles_post_ra>
// kernel: tpu_custom_call.1
= control target key start
LH: loop header
LB: loop body
LE: loop exit
PB: predicated region body
PF: predicated region fallthrough
CT: control target
= control target key end

     0   :  { %11 = vsyncpa [#allocation3], 0  ;;  %s782_s0 = inlined_call_operand.hbm [shape: bf16[2,16,64], index: 0, kind: input, shape index: {}]   ;;  %s783_s1 = inlined_call_operand.hbm [shape: bf16[64,128], index: 1, kind: input, shape index: {}]   ;;  %s784_s2 = inlined_call_operand.hbm [shape: bf16[64,128], index: 2, kind: input, shape index: {}]   ;;  %s785_s3 = inlined_call_operand.hbm [shape: f32[64,128], index: 3, kind: input, shape index: {}]   ;;  %s786_s4 = inlined_call_operand.vmem [shape: f32[1,128], index: 4, kind: input, shape index: {}]   ;;  %s787_s5 = inlined_call_operand.vmem [shape: f32[1,128], index: 5, kind: input, shape index: {}]   ;;  %s788_s6 = inlined_call_operand.hbm [shape: f32[2,128], index: 6, kind: output, shape index: {}]  }
   0x1   :  { %12 = vsyncpa [#allocation6], 0 }
   0x2   :  { %13 = vsyncpa [#allocation9], 0 }
   0x3   :  { %14 = vsyncpa [#allocation4], 0  ;;  %s701_s21 = smov [#allocation5]   ;;  %s702_s23 = smov [#allocation2]  }
   0x4   :  { %s32_s22 = sshll.u32 %s701_s21, 4  ;;  %s20_s24 = sshll.u32 %s702_s23, 4  ;;  %s33_s22 = int_to_ptr.vmem [resolvable:$true] %s32_s22  ;;  %s21_s24 = int_to_ptr.vmem [resolvable:$true] %s20_s24 }
   0x5   :  { %s601_s25 = scalar_lea.vmem %s33_s22, 512  ;;  %p606_p1 = scmp.lt.s32.totalorder %s33_s22, %s33_s22 }
   0x6   :  { %p602_p0 = scmp.ne.s32.totalorder %s33_s22, %s601_s25  ;;  %p607_p2 = scmp.lt.s32.totalorder %s601_s25, %s601_s25 }
   0x8   :  { %p608_p3 = por %p607_p2, %p606_p1 }
   0xa   :  { %p609_p4 = pnand %p608_p3, %p602_p0 }
   0xc   :  { %612 = shalt.err (!%p609_p4)
}
   0xd   :  { %s703_s26 = smov 64   ;;  %s704_s27 = smov 4  }
   0xe   :  { %38 = dma.hbm_to_vmem [thread:$0]  %s783_s1, 512, %s33_s22, [#allocation6], %s703_s26, %s703_s26, %s704_s27  }
   0xf   :  { %s621_s30 = scalar_lea.vmem %s21_s24, 256  ;;  %p626_p6 = scmp.lt.s32.totalorder %s21_s24, %s21_s24 }
  0x10   :  { %p622_p5 = scmp.ne.s32.totalorder %s21_s24, %s621_s30  ;;  %p627_p7 = scmp.lt.s32.totalorder %s621_s30, %s621_s30 }
  0x12   :  { %p628_p8 = por %p627_p7, %p626_p6 }
  0x14   :  { %p629_p9 = pnand %p628_p8, %p622_p5 }
  0x16   :  { %632 = shalt.err (!%p629_p9)
}
  0x17   :  { %26 = dma.hbm_to_vmem [thread:$0]  %s782_s0, 256, %s21_s24, [#allocation3], %s703_s26, %s703_s26, %s704_s27  }
  0x18   :  { %s705_s9 = smov [#allocation7]   ;;  %s706_s11 = smov [#allocation8]  }
  0x19   :  { %s44_s10 = sshll.u32 %s705_s9, 4  ;;  %s56_s12 = sshll.u32 %s706_s11, 4  ;;  %s45_s10 = int_to_ptr.vmem [resolvable:$true] %s44_s10  ;;  %s57_s12 = int_to_ptr.vmem [resolvable:$true] %s56_s12 }
  0x1a   :  { %s641_s13 = scalar_lea.vmem %s45_s10, 512  ;;  %p646_p11 = scmp.lt.s32.totalorder %s45_s10, %s45_s10 }
  0x1b   :  { %p642_p10 = scmp.ne.s32.totalorder %s45_s10, %s641_s13  ;;  %p647_p12 = scmp.lt.s32.totalorder %s641_s13, %s641_s13 }
  0x1d   :  { %p648_p13 = por %p647_p12, %p646_p11 }
  0x1f   :  { %p649_p0 = pnand %p648_p13, %p642_p10 }
  0x21   :  { %652 = shalt.err (!%p649_p0)
}
  0x22   :  { %50 = dma.hbm_to_vmem [thread:$0]  %s784_s2, 512, %s45_s10, [#allocation6], %s703_s26, %s703_s26, %s704_s27  }
  0x23   :  { %s661_s15 = scalar_lea.vmem %s57_s12, 1024  ;;  %p666_p2 = scmp.lt.s32.totalorder %s57_s12, %s57_s12 }
  0x24   :  { %p662_p1 = scmp.ne.s32.totalorder %s57_s12, %s661_s15  ;;  %p667_p3 = scmp.lt.s32.totalorder %s661_s15, %s661_s15 }
  0x26   :  { %p668_p4 = por %p667_p3, %p666_p2 }
  0x28   :  { %p669_p5 = pnand %p668_p4, %p662_p1 }
  0x2a   :  { %672 = shalt.err (!%p669_p5)
}
  0x2b   :  { %s707_s0 = smov 128   ;;  %s708_s16 = smov 8  }
  0x2c   :  { %62 = dma.hbm_to_vmem [thread:$0]  %s785_s3, 1024, %s57_s12, [#allocation9], %s707_s0, %s707_s0, %s708_s16  }
  0x2d   :  { %693 = dma.done.wait [#allocation3], 256  }
  0x2e   :  { %694 = vsyncadd [#allocation3], 4294967040 }
  0x2f   :  { %695 = dma.done.wait [#allocation6], 1024  }
  0x30   :  { %696 = vsyncadd [#allocation6], 4294966272 }
  0x31   :  { %697 = dma.done.wait [#allocation9], 1024  }
  0x32   :  { %698 = vsyncadd [#allocation9], 4294966272  ;;  %v569_v0 = vld [vmem:[#allocation5 + $0x18] sm:$0xff]   ;;  %v570_v1 = vld [vmem:[#allocation5 + $0x10] sm:$0xff]   ;;  %vm126_vm0 = vcmask 523264   ;;  %v709_v27 = vmov 0.0  }
  0x33   :  { %515 = vmatprep.subr.bf16.mxu0 %v569_v0  ;;  %v571_v2 = vld [vmem:[#allocation5 + $0x8] sm:$0xff]   ;;  %v80_v3 = vld [vmem:[#allocation2] sm:$0xff]   ;;  %v82_v4 = vld [vmem:[#allocation2 + $0x8] sm:$0xff]   ;;  %vm710_vm1 = vmmov 0   ;;  %vm373_vm2 = vcmask 1041409   ;;  %s711_s20 = smov [#allocation10]  }
  0x34   :  { %516 = vmatpush3.bf16.msra.mxu0 %v569_v0  ;;  %v338_v5 = vunpack.c.l.bf16 %v80_v3  ;;  %v339_v6 = vunpack.c.h.bf16 %v80_v3  ;;  %v575_v7 = vld [vmem:[#allocation7 + $0x18] sm:$0xff]   ;;  %v340_v8 = vunpack.c.l.bf16 %v82_v4  ;;  %v341_v9 = vunpack.c.h.bf16 %v82_v4  ;;  %v576_v10 = vld [vmem:[#allocation7 + $0x10] sm:$0xff]   ;;  %v572_v11 = vld [vmem:[#allocation5] sm:$0xff]   ;;  %523 = vmatprep.mubr.msk.bf16.mxu0 %vm126_vm0, %v80_v3  ;;  %s466_s21 = sshll.u32 %s711_s20, 4  ;;  %s467_s21 = int_to_ptr.vmem [resolvable:$true] %s466_s21 }
  0x35   :  { %517 = vmatprep.subr.bf16.mxu0 %v570_v1  ;;  %527 = vmatprep.subr.bf16.mxu1 %v575_v7  ;;  %v577_v19 = vld [vmem:[#allocation7 + $0x8] sm:$0xff]   ;;  %v578_v24 = vld [vmem:[#allocation7] sm:$0xff]   ;;  %v370_v28 = vld [vmem:[#allocation8 + $0x38] sm:$0xff]  ;;  %s673_s22 = scalar_lea.vmem %s467_s21, 32  ;;  %p678_p7 = scmp.lt.s32.totalorder %s467_s21, %s467_s21 }
  0x36   :  { %v342_v12 = vsel %vm126_vm0, %v338_v5, 0.0  ;;  %v343_v13 = vsel %vm126_vm0, %v339_v6, 0.0  ;;  %v351_v15 = vsel %vm126_vm0, %v340_v8, 0.0  ;;  %v352_v16 = vsel %vm126_vm0, %v341_v9, 0.0  ;;  %528 = vmatpush3.bf16.msra.mxu1 %v575_v7  ;;  %535 = vmatprep.mubr.msk.bf16.mxu1 %vm126_vm0, %v80_v3  ;;  %v369_v30 = vld [vmem:[#allocation8 + $0x30] sm:$0xff]  ;;  %v368_v33 = vld [vmem:[#allocation8 + $0x28] sm:$0xff]  ;;  %p674_p6 = scmp.ne.s32.totalorder %s467_s21, %s673_s22  ;;  %p679_p8 = scmp.lt.s32.totalorder %s673_s22, %s673_s22 }
  0x37   :  { %v344_v14 = vadd.f32 %v343_v13, %v342_v12  ;;  %v353_v17 = vadd.f32 %v352_v16, %v351_v15  ;;  %529 = vmatprep.subr.bf16.mxu1 %v576_v10  ;;  %v367_v34 = vld [vmem:[#allocation8 + $0x20] sm:$0xff]  ;;  %v366_v37 = vld [vmem:[#allocation8 + $0x18] sm:$0xff]  ;;  %v365_v38 = vld [vmem:[#allocation8 + $0x10] sm:$0xff] }
  0x38   :  { %518 = vmatpush3.bf16.msra.mxu0 %v570_v1  ;;  %v364_v41 = vld [vmem:[#allocation8 + $0x8] sm:$0xff]  ;;  %v363_v42 = vld [vmem:[#allocation8] sm:$0xff]  ;;  %p680_p9 = por %p679_p8, %p678_p7 }
  0x39   :  { %519 = vmatprep.subr.bf16.mxu0 %v571_v2  ;;  %v345_v18 = vrot.slane %v344_v14, 4  ;;  %v354_v20 = vrot.slane %v353_v17, 4 }
  0x3a   :  { %530 = vmatpush3.bf16.msra.mxu1 %v576_v10  ;;  %p681_p10 = pnand %p680_p9, %p674_p6 }
  0x3b   :  { %v346_v21 = vadd.f32 %v345_v18, %v344_v14  ;;  %v355_v22 = vadd.f32 %v354_v20, %v353_v17  ;;  %531 = vmatprep.subr.bf16.mxu1 %v577_v19 }
  0x3c   :  { %520 = vmatpush3.bf16.msra.mxu0 %v571_v2 }
  0x3d   :  { %521 = vmatprep.subr.bf16.mxu0 %v572_v11  ;;  %v347_v23 = vrot.slane %v346_v21, 2  ;;  %v356_v25 = vrot.slane %v355_v22, 2 }
  0x3e   :  { %532 = vmatpush3.bf16.msra.mxu1 %v577_v19 }
  0x3f   :  { %v348_v26 = vadd.f32 %v347_v23, %v346_v21  ;;  %v357_v29 = vadd.f32 %v356_v25, %v355_v22  ;;  %533 = vmatprep.subr.bf16.mxu1 %v578_v24 }
  0x40   :  { %522 = vmatpush3.bf16.msra.mxu0 %v572_v11 }
  0x41   :  { %539 = vmatprep.subr.mxu0 %v709_v27  ;;  %v349_v31 = vrot.slane %v348_v26, 1  ;;  %v358_v32 = vrot.slane %v357_v29, 1 }
  0x42   :  { %534 = vmatpush3.bf16.msra.mxu1 %v578_v24 }
  0x43   :  { %524 = vmatmul.mubr.msk.bf16.vlgmr.msra.gmra.mxu0 %vm126_vm0, %v82_v4  ;;  %v350_v35 = vadd.f32 %v349_v31, %v348_v26  ;;  %v359_v36 = vadd.f32 %v358_v32, %v357_v29  ;;  %v491_v29 = vld [vmem:[%s786_s4] ss:$0 sm:$0xff] }
  0x44   :  { %540 = vmatpush3.msra.mxu0 %v370_v28  ;;  %555 = vmatprep.mubr.msk.f32.mxu0 %vm710_vm1, %v709_v27 }
  0x45   :  { %541 = vmatprep.subr.mxu0 %v709_v27  ;;  %536 = vmatmul.mubr.msk.bf16.vlgmr.msra.gmra.mxu1 %vm126_vm0, %v82_v4  ;;  %v361_v39 = vmul.f32 0.0625, %v350_v35  ;;  %v362_v40 = vmul.f32 0.0625, %v359_v36 }
  0x46   :  { %542 = vmatpush3.msra.mxu0 %v369_v30 }
  0x47   :  { %543 = vmatprep.subr.mxu0 %v709_v27  ;;  %v374_v43 = vsel %vm373_vm2, %v362_v40, %v361_v39 }
  0x48   :  { %544 = vmatpush3.msra.mxu0 %v368_v33 }
  0x49   :  { %545 = vmatprep.subr.mxu0 %v709_v27 }
  0x4a   :  { %546 = vmatpush3.msra.mxu0 %v367_v34 }
  0x4b   :  { %547 = vmatprep.subr.mxu0 %v709_v27 }
  0x4c   :  { %548 = vmatpush3.msra.mxu0 %v366_v37 }
  0x4d   :  { %549 = vmatprep.subr.mxu0 %v709_v27 }
  0x4e   :  { %550 = vmatpush3.msra.mxu0 %v365_v38 }
  0x4f   :  { %551 = vmatprep.subr.mxu0 %v709_v27 }
  0x50   :  { %552 = vmatpush3.msra.mxu0 %v364_v41 }
  0x51   :  { %553 = vmatprep.subr.mxu0 %v709_v27 }
  0x52   :  { %554 = vmatpush3.msra.mxu0 %v363_v42 }
  0x53   :  { %556 = vmatmul.mubr.msk.f32.vlgmr.msra.gmra.mxu0 %vm126_vm0, %v374_v43 }
 0x103   :  { %v525_v44 = vpop.f32.mrf.mxu0 }
 0x105   :  { %v167_v45 = vpop.f32.mrf.mxu0  ;;  %v537_v25 = vpop.f32.mrf.mxu1 }
 0x106   :  { %v318_v33 = vadd.f32 %v537_v25, %v491_v29 }
 0x107   :  { %v526_v46 = vpop.f32.mrf.mxu0  ;;  %v294_v27 = vpop.f32.mrf.mxu1 }
 0x108   :  { %v189_v47 = vmax.f32 %v525_v44, %v526_v46  ;;  %v316_v37 = vadd.f32 %v491_v29, %v294_v27 }
 0x109   :  { %v170_v48 = vpop.f32.mrf.mxu0  ;;  %v538_v28 = vpop.f32.mrf.mxu1 }
 0x10a   :  { %v190_v49 = vrot.slane %v189_v47, 4  ;;  %v182_v50 = vmax.f32 %v167_v45, %v170_v48  ;;  %v319_v35 = vadd.f32 %v538_v28, %v491_v29 }
 0x10b   :  { %v297_v30 = vpop.f32.mrf.mxu1 }
 0x10c   :  { %v191_v51 = vmax.f32 %v189_v47, %v190_v49  ;;  %v183_v52 = vrot.slane %v182_v50, 4  ;;  %v317_v38 = vadd.f32 %v491_v29, %v297_v30 }
 0x10e   :  { %v192_v53 = vrot.slane %v191_v51, 2  ;;  %v184_v54 = vmax.f32 %v182_v50, %v183_v52 }
 0x110   :  { %v193_v55 = vmax.f32 %v191_v51, %v192_v53  ;;  %v185_v56 = vrot.slane %v184_v54, 2 }
 0x112   :  { %v194_v57 = vrot.slane %v193_v55, 1  ;;  %v186_v58 = vmax.f32 %v184_v54, %v185_v56 }
 0x113   :  { %v769_v59 = vpop.f32.mrf.mxu0 }
 0x114   :  { %v195_v60 = vmax.f32 %v193_v55, %v194_v57  ;;  %v187_v61 = vrot.slane %v186_v58, 1 }
 0x115   :  { %v557_v62 = vpop.f32.mrf.mxu0 }
 0x116   :  { %v198_v63 = vsub.f32 %v525_v44, %v195_v60  ;;  %v199_v0 = vsub.f32 %v526_v46, %v195_v60  ;;  %v188_v1 = vmax.f32 %v186_v58, %v187_v61  ;;  %v493_v61 = vld [vmem:[%s787_s5] ss:$0 sm:$0xff] }
 0x118   :  { %v204_v2 = vmul.f32 1.442695, %v198_v63  ;;  %v206_v3 = vmul.f32 1.442695, %v199_v0  ;;  %v196_v4 = vsub.f32 %v167_v45, %v188_v1  ;;  %v197_v5 = vsub.f32 %v170_v48, %v188_v1 }
 0x11a   :  { %581 = vpow2.f32 %v204_v2  ;;  %v200_v6 = vmul.f32 1.442695, %v196_v4  ;;  %v202_v7 = vmul.f32 1.442695, %v197_v5 }
 0x11b   :  { %583 = vpow2.f32 %v206_v3 }
 0x11c   :  { %585 = vpow2.f32 %v200_v6 }
 0x11d   :  { %587 = vpow2.f32 %v202_v7 }
 0x127   :  { %v582_v8 = vpop.eup %581 }
 0x128   :  { %v584_v9 = vpop.eup %583 }
 0x129   :  { %v586_v10 = vpop.eup %585  ;;  %v215_v11 = vadd.f32 %v584_v9, %v582_v8 }
 0x12a   :  { %v588_v12 = vpop.eup %587 }
 0x12b   :  { %v216_v13 = vrot.slane %v215_v11, 4  ;;  %v208_v14 = vadd.f32 %v588_v12, %v586_v10 }
 0x12d   :  { %v217_v15 = vadd.f32 %v216_v13, %v215_v11  ;;  %v209_v16 = vrot.slane %v208_v14, 4 }
 0x12f   :  { %v218_v17 = vrot.slane %v217_v15, 2  ;;  %v210_v18 = vadd.f32 %v209_v16, %v208_v14 }
 0x131   :  { %v219_v19 = vadd.f32 %v218_v17, %v217_v15  ;;  %v211_v20 = vrot.slane %v210_v18, 2 }
 0x133   :  { %v212_v21 = vadd.f32 %v211_v20, %v210_v18  ;;  %v220_v22 = vrot.slane %v219_v19, 1 }
 0x135   :  { %v221_v23 = vadd.f32 %v220_v22, %v219_v19  ;;  %v213_v24 = vrot.slane %v212_v21, 1 }
 0x137   :  { %589 = vrcp.f32 %v221_v23  ;;  %v214_v26 = vadd.f32 %v213_v24, %v212_v21 }
 0x139   :  { %591 = vrcp.f32 %v214_v26 }
 0x144   :  { %v590_v31 = vpop.eup %589 }
 0x145   :  { %v226_v32 = vmul.f32 %v590_v31, %v582_v8  ;;  %v227_v34 = vmul.f32 %v590_v31, %v584_v9 }
 0x146   :  { %v592_v36 = vpop.eup %591 }
 0x147   :  { %v322_v39 = vmul.f32 %v318_v33, %v226_v32  ;;  %v224_v40 = vmul.f32 %v592_v36, %v586_v10  ;;  %v323_v41 = vmul.f32 %v319_v35, %v227_v34  ;;  %v225_v42 = vmul.f32 %v592_v36, %v588_v12 }
 0x149   :  { %v320_v43 = vmul.f32 %v316_v37, %v224_v40  ;;  %v331_v44 = vadd.f32 %v323_v41, %v322_v39  ;;  %v321_v45 = vmul.f32 %v317_v38, %v225_v42 }
 0x14b   :  { %v332_v46 = vrot.slane %v331_v44, 4  ;;  %v324_v47 = vadd.f32 %v321_v45, %v320_v43 }
 0x14d   :  { %v333_v48 = vadd.f32 %v332_v46, %v331_v44  ;;  %v325_v49 = vrot.slane %v324_v47, 4 }
 0x14f   :  { %v334_v50 = vrot.slane %v333_v48, 2  ;;  %v326_v51 = vadd.f32 %v325_v49, %v324_v47 }
 0x151   :  { %v327_v52 = vrot.slane %v326_v51, 2  ;;  %v335_v53 = vadd.f32 %v334_v50, %v333_v48 }
 0x153   :  { %v328_v54 = vadd.f32 %v327_v52, %v326_v51  ;;  %v336_v55 = vrot.slane %v335_v53, 1 }
 0x155   :  { %v329_v56 = vrot.slane %v328_v54, 1  ;;  %v337_v58 = vadd.f32 %v336_v55, %v335_v53 }
 0x157   :  { %v330_v57 = vadd.f32 %v329_v56, %v328_v54 }
 0x159   :  { %v377_v60 = vsel %vm373_vm2, %v337_v58, %v330_v57 }
 0x15a   :  { %v448_v62 = vadd.f32 %v769_v59, %v377_v60 }
 0x15c   :  { %v458_v63 = vadd.f32 %v493_v61, %v448_v62 }
 0x15e   :  { %459 = vst [vmem:[#allocation10] sm:$0x3] %v458_v63 }
 0x15f   :  { %684 = shalt.err (!%p681_p10)
}
 0x160   :  { %469 = dma.vmem_to_hbm [thread:$0]  %s467_s21, 32, %s788_s6, [#allocation4]  }
 0x161   :  { %699 = dma.done.wait [#allocation4], 32  }
 0x162   :  { %700 = vsyncadd [#allocation4], 4294967264 }
 0x163   :  { %473 = vsyncpa [#allocation3], 1 }
 0x164   :  { %474 = vsyncpa [#allocation6], 1 }
 0x165   :  { %475 = vsyncpa [#allocation9], 1 }
 0x166   :  { %476 = vsyncpa [#allocation4], 1 }

</bundles_post_ra>
